<compile_context>
chip_gen: v6e
topology: v6e:2x2x1
jax: 0.10.0
libtpu: 0.0.40
codegen_flags: <defaults>
</compile_context>

<pallas_src>
import jax
import jax.numpy as jnp
from jax import lax
from jax.experimental import pallas as pl
from jax.experimental.pallas import tpu as pltpu

_LANES = 128


def _round_up(x, m):
    return ((x + m - 1) // m) * m


def _sublane(dtype):
    # sublane tile: 8 for 4-byte, 16 for 2-byte, 32 for 1-byte dtypes.
    return max(8, 32 // jnp.dtype(dtype).itemsize)


def _pad_to_slab(x, padded_rows):
    """Flatten x and zero-pad to a lane/sublane-dense (padded_rows, 128) slab."""
    flat = jnp.reshape(x, (-1,))
    pad = padded_rows * _LANES - flat.shape[0]
    if pad:
        flat = jnp.pad(flat, (0, pad))
    return jnp.reshape(flat, (padded_rows, _LANES))


def _make_kernel(block_rows, ls_block_rows, h_block_rows, blocks_per_core,
                 mask_rows):
    def _fold(sq, rows):
        # Fold (rows, 128) down to one (8,128) vreg with pure VPU adds.
        return jnp.sum(sq.reshape(rows // 8, 8, _LANES), axis=0)

    def kernel(img_a_ref, img_b_ref, ls_a_ref, ls_b_ref, h_a_ref, h_b_ref,
               out_ref, acc_img, acc_ls, acc_h):
        c = pl.program_id(0)        # core-half (parallel on v7x megacore)
        j = pl.program_id(1)        # streamed block within this half

        @pl.when(j == 0)
        def _init():
            acc_img[...] = jnp.zeros_like(acc_img)
            acc_ls[...] = jnp.zeros_like(acc_ls)
            acc_h[...] = jnp.zeros_like(acc_h)

        # Dominant streamed image pair.
        d = img_a_ref[...].astype(jnp.float32) - img_b_ref[...].astype(jnp.float32)
        sq = d * d
        if mask_rows is not None:
            # Ragged tail of the unpadded stream: zero out rows past the true
            # extent (jnp.where select is safe even if the tail holds NaN/inf).
            row0 = (c * blocks_per_core + j) * block_rows
            row = row0 + lax.broadcasted_iota(jnp.int32, sq.shape, 0)
            sq = jnp.where(row < mask_rows, sq, 0.0)
        acc_img[...] += _fold(sq, block_rows)

        # Small streamed aux pairs (zero-padded on both sides -> no masking).
        d_ls = ls_a_ref[...].astype(jnp.float32) - ls_b_ref[...].astype(jnp.float32)
        acc_ls[...] += _fold(d_ls * d_ls, ls_block_rows)

        d_h = h_a_ref[...].astype(jnp.float32) - h_b_ref[...].astype(jnp.float32)
        acc_h[...] += _fold(d_h * d_h, h_block_rows)

        @pl.when(j == blocks_per_core - 1)
        def _finalize():
            img_sum = jnp.sum(acc_img[...])
            ls_sum = jnp.sum(acc_ls[...])
            h_sum = jnp.sum(acc_h[...])
            lane = lax.broadcasted_iota(jnp.int32, (8, _LANES), 1)
            vals = jnp.where(lane == 0, img_sum,
                             jnp.where(lane == 1, ls_sum,
                                       jnp.where(lane == 2, h_sum, 0.0)))
            out_ref[...] = vals            # one lane-dense (8,128) store

    return kernel


def _generator_loss(out_labels, out_images, target_images,
                    fake_landsea, fake_hight, real_landsea, real_hight):
    # ---- true (unpadded) element counts -----------------------------------
    n_img = int(out_images.size)
    n_ls = int(fake_landsea.size)
    n_h = int(fake_hight.size)

    img_itemsize = max(jnp.dtype(out_images.dtype).itemsize,
                       jnp.dtype(target_images.dtype).itemsize)
    sub = max(_sublane(out_images.dtype), _sublane(target_images.dtype))

    # ---- layout plan: ~2 MiB per operand per streamed block ---------------
    max_block_rows = max(sub,
                         ((2 * 1024 * 1024) // (_LANES * img_itemsize)) // sub * sub)
    rows_total = pl.cdiv(n_img, _LANES)
    raw_blocks = pl.cdiv(rows_total, max_block_rows)
    blocks_per_core = pl.cdiv(raw_blocks, 2)      # leading 2-way (v7x) split
    num_blocks = 2 * blocks_per_core
    block_rows = _round_up(pl.cdiv(rows_total, num_blocks), sub)
    covered_rows = block_rows * num_blocks

    # ---- zero-copy path for the dominant image pair when layout allows ----
    no_pad = (n_img % _LANES == 0
              and rows_total % sub == 0
              and block_rows * (num_blocks - 1) < rows_total)
    if no_pad:
        img_a = jnp.reshape(out_images, (rows_total, _LANES))     # no HBM copy
        img_b = jnp.reshape(target_images, (rows_total, _LANES))
        mask_rows = rows_total if covered_rows > rows_total else None
    else:
        img_a = _pad_to_slab(out_images, covered_rows)
        img_b = _pad_to_slab(target_images, covered_rows)
        mask_rows = None

    # ---- small aux pairs streamed on the same grid (zero-padded) ----------
    ls_sub = max(_sublane(fake_landsea.dtype), _sublane(real_landsea.dtype))
    h_sub = max(_sublane(fake_hight.dtype), _sublane(real_hight.dtype))
    ls_block_rows = _round_up(pl.cdiv(pl.cdiv(n_ls, _LANES), num_blocks), ls_sub)
    h_block_rows = _round_up(pl.cdiv(pl.cdiv(n_h, _LANES), num_blocks), h_sub)
    ls_a = _pad_to_slab(fake_landsea, ls_block_rows * num_blocks)
    ls_b = _pad_to_slab(real_landsea, ls_block_rows * num_blocks)
    h_a = _pad_to_slab(fake_hight, h_block_rows * num_blocks)
    h_b = _pad_to_slab(real_hight, h_block_rows * num_blocks)

    kernel = _make_kernel(block_rows, ls_block_rows, h_block_rows,
                          blocks_per_core, mask_rows)

    def _stream_map(c, j):
        return (c * blocks_per_core + j, 0)

    img_spec = pl.BlockSpec((block_rows, _LANES), _stream_map)
    ls_spec = pl.BlockSpec((ls_block_rows, _LANES), _stream_map)
    h_spec = pl.BlockSpec((h_block_rows, _LANES), _stream_map)
    out_spec = pl.BlockSpec((8, _LANES), lambda c, j: (c, 0))

    # ---- capacity-aware VMEM budget + cost hint ----------------------------
    def _bytes(a):
        return int(a.size) * jnp.dtype(a.dtype).itemsize

    def _block_bytes(rows, a):
        return rows * _LANES * jnp.dtype(a.dtype).itemsize

    needed = (2 * (_block_bytes(block_rows, img_a) + _block_bytes(block_rows, img_b)
                   + _block_bytes(ls_block_rows, ls_a) + _block_bytes(ls_block_rows, ls_b)
                   + _block_bytes(h_block_rows, h_a) + _block_bytes(h_block_rows, h_b))
              + 3 * 8 * _LANES * 4            # accumulator scratches
              + 2 * 8 * _LANES * 4)           # output block
    try:
        vmem_cap = int(getattr(pltpu.get_tpu_info(), "vmem_capacity_bytes",
                               64 * 1024 * 1024))
    except Exception:  # pragma: no cover - conservative fallback
        vmem_cap = 64 * 1024 * 1024
    vmem_limit = int(min(vmem_cap // 2, max(32 * 1024 * 1024, 2 * needed)))

    total_in_bytes = (_bytes(img_a) + _bytes(img_b) + _bytes(ls_a) + _bytes(ls_b)
                      + _bytes(h_a) + _bytes(h_b))
    cost = pl.CostEstimate(flops=3 * (n_img + n_ls + n_h),
                           transcendentals=0,
                           bytes_accessed=total_in_bytes + 16 * _LANES * 4)

    partials = pl.pallas_call(
        kernel,
        out_shape=jax.ShapeDtypeStruct((16, _LANES), jnp.float32),
        grid=(2, blocks_per_core),
        in_specs=[img_spec, img_spec, ls_spec, ls_spec, h_spec, h_spec],
        out_specs=out_spec,
        scratch_shapes=[pltpu.VMEM((8, _LANES), jnp.float32)] * 3,
        compiler_params=pltpu.CompilerParams(
            dimension_semantics=("parallel", "arbitrary"),
            vmem_limit_bytes=vmem_limit),
        cost_estimate=cost,
    )(img_a, img_b, ls_a, ls_b, h_a, h_b)

    # Combine the two core-halves' raw partial sums; divide by TRUE counts.
    sums = partials[0, :3] + partials[8, :3]
    image_loss = sums[0] / n_img
    landsea_loss = sums[1] / n_ls
    hight_loss = sums[2] / n_h

    # out_labels has only B elements — cheaper outside the streamed pipeline.
    adversarial_loss = jnp.mean(1.0 - out_labels.astype(jnp.float32))

    image_los = image_loss * 0.9 + landsea_loss * 0.5 + hight_loss * 2e-05
    return (image_los + adversarial_loss,
            image_loss * 0.9,
            landsea_loss * 0.2,   # 0.2 vs the 0.5 weight above: preserved quirk
            hight_loss * 2e-05,
            adversarial_loss)


# Jit the whole wrapper: reshapes, pallas_call, label mean and coefficient
# combine fuse into a single dispatch.
generator_loss = jax.jit(_generator_loss)


if __name__ == "__main__":
    key = jax.random.PRNGKey(0)
    keys = jax.random.split(key, 7)

    B, C, H, W = 2, 4, 16, 16
    out_labels = jax.random.uniform(keys[0], (B,), dtype=jnp.float32)
    out_images = jax.random.normal(keys[1], (B, C, H, W), dtype=jnp.float32)
    target_images = jax.random.normal(keys[2], (B, C, H, W), dtype=jnp.float32)
    fake_landsea = jax.random.normal(keys[3], (B, 1, H, W), dtype=jnp.float32)
    real_landsea = jax.random.normal(keys[4], (B, 1, H, W), dtype=jnp.float32)
    fake_hight = jax.random.normal(keys[5], (B, 1, H, W), dtype=jnp.float32)
    real_hight = jax.random.normal(keys[6], (B, 1, H, W), dtype=jnp.float32)

    result = generator_loss(out_labels, out_images, target_images,
                            fake_landsea, fake_hight, real_landsea, real_hight)
    result = jax.block_until_ready(result)

    # Pure-JAX reference check.
    adv_ref = jnp.mean(1.0 - out_labels)
    img_ref = jnp.mean((out_images - target_images) ** 2)
    ls_ref = jnp.mean((fake_landsea - real_landsea) ** 2)
    h_ref = jnp.mean((fake_hight - real_hight) ** 2)
    ref = (img_ref * 0.9 + ls_ref * 0.5 + h_ref * 2e-05 + adv_ref,
           img_ref * 0.9, ls_ref * 0.2, h_ref * 2e-05, adv_ref)
    for got, want in zip(result, ref):
        assert jnp.allclose(got, want, rtol=1e-5, atol=1e-6), (got, want)

    print("KERNEL_OK")
</pallas_src>

<mosaic_0001>
module attributes {stable_mosaic.version = 11 : i64} {
  func.func @kernel(%arg0: i32, %arg1: i32, %arg2: memref<8x128xf32, #tpu.memory_space<vmem>>, %arg3: memref<8x128xf32, #tpu.memory_space<vmem>>, %arg4: memref<8x128xf32, #tpu.memory_space<vmem>>, %arg5: memref<8x128xf32, #tpu.memory_space<vmem>>, %arg6: memref<8x128xf32, #tpu.memory_space<vmem>>, %arg7: memref<8x128xf32, #tpu.memory_space<vmem>>, %arg8: memref<8x128xf32, #tpu.memory_space<vmem>>, %arg9: memref<8x128xf32, #tpu.memory_space<vmem>>, %arg10: memref<8x128xf32, #tpu.memory_space<vmem>>, %arg11: memref<8x128xf32, #tpu.memory_space<vmem>>) attributes {dimension_semantics = [#tpu.dimension_semantics<parallel>, #tpu.dimension_semantics<arbitrary>], iteration_bounds = array<i64: 2, 1>, scalar_prefetch = 0 : i64, scratch_operands = 3 : i64, tpu.core_type = #tpu.core_type<tc>, window_params = [{transform_indices = @transform_0, window_bounds = array<i64: 8, 128>}, {transform_indices = @transform_1, window_bounds = array<i64: 8, 128>}, {transform_indices = @transform_2, window_bounds = array<i64: 8, 128>}, {transform_indices = @transform_3, window_bounds = array<i64: 8, 128>}, {transform_indices = @transform_4, window_bounds = array<i64: 8, 128>}, {transform_indices = @transform_5, window_bounds = array<i64: 8, 128>}, {transform_indices = @transform_6, window_bounds = array<i64: 8, 128>}]} {
    %c0_i32 = arith.constant 0 : i32
    %0 = arith.cmpi eq, %arg1, %c0_i32 : i32
    %1 = arith.extui %0 : i1 to i32
    %c0_i32_0 = arith.constant 0 : i32
    %2 = arith.cmpi ne, %1, %c0_i32_0 : i32
    scf.if %2 {
      %cst_28 = arith.constant 0.000000e+00 : f32
      %33 = vector.broadcast %cst_28 : f32 to vector<8x128xf32>
      %c0_29 = arith.constant 0 : index
      %c0_30 = arith.constant 0 : index
      %34 = vector.load %arg9[%c0_29, %c0_30] : memref<8x128xf32, #tpu.memory_space<vmem>>, vector<8x128xf32>
      tpu.vector_store %arg9[%c0_29, %c0_30], %33 {strides = array<i32>} : memref<8x128xf32, #tpu.memory_space<vmem>>, vector<8x128xf32>,
      %cst_31 = arith.constant 0.000000e+00 : f32
      %35 = vector.broadcast %cst_31 : f32 to vector<8x128xf32>
      %c0_32 = arith.constant 0 : index
      %c0_33 = arith.constant 0 : index
      %36 = vector.load %arg10[%c0_32, %c0_33] : memref<8x128xf32, #tpu.memory_space<vmem>>, vector<8x128xf32>
      tpu.vector_store %arg10[%c0_32, %c0_33], %35 {strides = array<i32>} : memref<8x128xf32, #tpu.memory_space<vmem>>, vector<8x128xf32>,
      %cst_34 = arith.constant 0.000000e+00 : f32
      %37 = vector.broadcast %cst_34 : f32 to vector<8x128xf32>
      %c0_35 = arith.constant 0 : index
      %c0_36 = arith.constant 0 : index
      %38 = vector.load %arg11[%c0_35, %c0_36] : memref<8x128xf32, #tpu.memory_space<vmem>>, vector<8x128xf32>
      tpu.vector_store %arg11[%c0_35, %c0_36], %37 {strides = array<i32>} : memref<8x128xf32, #tpu.memory_space<vmem>>, vector<8x128xf32>,
    } else {
    }
    %c0 = arith.constant 0 : index
    %c0_1 = arith.constant 0 : index
    %3 = vector.load %arg2[%c0, %c0_1] : memref<8x128xf32, #tpu.memory_space<vmem>>, vector<8x128xf32>
    %c0_2 = arith.constant 0 : index
    %c0_3 = arith.constant 0 : index
    %4 = vector.load %arg3[%c0_2, %c0_3] : memref<8x128xf32, #tpu.memory_space<vmem>>, vector<8x128xf32>
    %5 = arith.subf %3, %4 : vector<8x128xf32>
    %6 = arith.mulf %5, %5 : vector<8x128xf32>
    %c0_4 = arith.constant 0 : index
    %c0_5 = arith.constant 0 : index
    %7 = vector.load %arg9[%c0_4, %c0_5] : memref<8x128xf32, #tpu.memory_space<vmem>>, vector<8x128xf32>
    %8 = vector.shape_cast %6 : vector<8x128xf32> to vector<1x8x128xf32>
    %cst = arith.constant dense<0.000000e+00> : vector<8x128xf32>
    %9 = vector.multi_reduction <add>, %8, %cst [0] : vector<1x8x128xf32> to vector<8x128xf32>
    %10 = arith.addf %7, %9 : vector<8x128xf32>
    %c0_6 = arith.constant 0 : index
    %c0_7 = arith.constant 0 : index
    %11 = vector.load %arg9[%c0_6, %c0_7] : memref<8x128xf32, #tpu.memory_space<vmem>>, vector<8x128xf32>
    tpu.vector_store %arg9[%c0_6, %c0_7], %10 {strides = array<i32>} : memref<8x128xf32, #tpu.memory_space<vmem>>, vector<8x128xf32>,
    %c0_8 = arith.constant 0 : index
    %c0_9 = arith.constant 0 : index
    %12 = vector.load %arg4[%c0_8, %c0_9] : memref<8x128xf32, #tpu.memory_space<vmem>>, vector<8x128xf32>
    %c0_10 = arith.constant 0 : index
    %c0_11 = arith.constant 0 : index
    %13 = vector.load %arg5[%c0_10, %c0_11] : memref<8x128xf32, #tpu.memory_space<vmem>>, vector<8x128xf32>
    %14 = arith.subf %12, %13 : vector<8x128xf32>
    %c0_12 = arith.constant 0 : index
    %c0_13 = arith.constant 0 : index
    %15 = vector.load %arg10[%c0_12, %c0_13] : memref<8x128xf32, #tpu.memory_space<vmem>>, vector<8x128xf32>
    %16 = arith.mulf %14, %14 : vector<8x128xf32>
    %17 = vector.shape_cast %16 : vector<8x128xf32> to vector<1x8x128xf32>
    %cst_14 = arith.constant dense<0.000000e+00> : vector<8x128xf32>
    %18 = vector.multi_reduction <add>, %17, %cst_14 [0] : vector<1x8x128xf32> to vector<8x128xf32>
    %19 = arith.addf %15, %18 : vector<8x128xf32>
    %c0_15 = arith.constant 0 : index
    %c0_16 = arith.constant 0 : index
    %20 = vector.load %arg10[%c0_15, %c0_16] : memref<8x128xf32, #tpu.memory_space<vmem>>, vector<8x128xf32>
    tpu.vector_store %arg10[%c0_15, %c0_16], %19 {strides = array<i32>} : memref<8x128xf32, #tpu.memory_space<vmem>>, vector<8x128xf32>,
    %c0_17 = arith.constant 0 : index
    %c0_18 = arith.constant 0 : index
    %21 = vector.load %arg6[%c0_17, %c0_18] : memref<8x128xf32, #tpu.memory_space<vmem>>, vector<8x128xf32>
    %c0_19 = arith.constant 0 : index
    %c0_20 = arith.constant 0 : index
    %22 = vector.load %arg7[%c0_19, %c0_20] : memref<8x128xf32, #tpu.memory_space<vmem>>, vector<8x128xf32>
    %23 = arith.subf %21, %22 : vector<8x128xf32>
    %c0_21 = arith.constant 0 : index
    %c0_22 = arith.constant 0 : index
    %24 = vector.load %arg11[%c0_21, %c0_22] : memref<8x128xf32, #tpu.memory_space<vmem>>, vector<8x128xf32>
    %25 = arith.mulf %23, %23 : vector<8x128xf32>
    %26 = vector.shape_cast %25 : vector<8x128xf32> to vector<1x8x128xf32>
    %cst_23 = arith.constant dense<0.000000e+00> : vector<8x128xf32>
    %27 = vector.multi_reduction <add>, %26, %cst_23 [0] : vector<1x8x128xf32> to vector<8x128xf32>
    %28 = arith.addf %24, %27 : vector<8x128xf32>
    %c0_24 = arith.constant 0 : index
    %c0_25 = arith.constant 0 : index
    %29 = vector.load %arg11[%c0_24, %c0_25] : memref<8x128xf32, #tpu.memory_space<vmem>>, vector<8x128xf32>
    tpu.vector_store %arg11[%c0_24, %c0_25], %28 {strides = array<i32>} : memref<8x128xf32, #tpu.memory_space<vmem>>, vector<8x128xf32>,
    %c0_i32_26 = arith.constant 0 : i32
    %30 = arith.cmpi eq, %arg1, %c0_i32_26 : i32
    %31 = arith.extui %30 : i1 to i32
    %c0_i32_27 = arith.constant 0 : i32
    %32 = arith.cmpi ne, %31, %c0_i32_27 : i32
    scf.if %32 {
      %c0_28 = arith.constant 0 : index
      %c0_29 = arith.constant 0 : index
      %33 = vector.load %arg9[%c0_28, %c0_29] : memref<8x128xf32, #tpu.memory_space<vmem>>, vector<8x128xf32>
      %34 = vector.shape_cast %33 : vector<8x128xf32> to vector<1x8x128xf32>
      %cst_30 = arith.constant dense<0.000000e+00> : vector<1xf32>
      %35 = vector.multi_reduction <add>, %34, %cst_30 [1, 2] : vector<1x8x128xf32> to vector<1xf32>
      %36 = vector.shape_cast %35 : vector<1xf32> to vector<1x1x1xf32>
      %37 = vector.extract %36[0, 0, 0] : f32 from vector<1x1x1xf32>
      %c0_31 = arith.constant 0 : index
      %c0_32 = arith.constant 0 : index
      %38 = vector.load %arg10[%c0_31, %c0_32] : memref<8x128xf32, #tpu.memory_space<vmem>>, vector<8x128xf32>
      %39 = vector.shape_cast %38 : vector<8x128xf32> to vector<1x8x128xf32>
      %cst_33 = arith.constant dense<0.000000e+00> : vector<1xf32>
      %40 = vector.multi_reduction <add>, %39, %cst_33 [1, 2] : vector<1x8x128xf32> to vector<1xf32>
      %41 = vector.shape_cast %40 : vector<1xf32> to vector<1x1x1xf32>
      %42 = vector.extract %41[0, 0, 0] : f32 from vector<1x1x1xf32>
      %c0_34 = arith.constant 0 : index
      %c0_35 = arith.constant 0 : index
      %43 = vector.load %arg11[%c0_34, %c0_35] : memref<8x128xf32, #tpu.memory_space<vmem>>, vector<8x128xf32>
      %44 = vector.shape_cast %43 : vector<8x128xf32> to vector<1x8x128xf32>
      %cst_36 = arith.constant dense<0.000000e+00> : vector<1xf32>
      %45 = vector.multi_reduction <add>, %44, %cst_36 [1, 2] : vector<1x8x128xf32> to vector<1xf32>
      %46 = vector.shape_cast %45 : vector<1xf32> to vector<1x1x1xf32>
      %47 = vector.extract %46[0, 0, 0] : f32 from vector<1x1x1xf32>
      %48 = tpu.iota {dimensions = array<i32: 1>} : vector<8x128xi32>
      %c0_i32_37 = arith.constant 0 : i32
      %49 = vector.broadcast %c0_i32_37 : i32 to vector<8x128xi32>
      %50 = arith.cmpi eq, %48, %49 : vector<8x128xi32>
      %c1_i32 = arith.constant 1 : i32
      %51 = vector.broadcast %c1_i32 : i32 to vector<8x128xi32>
      %52 = arith.cmpi eq, %48, %51 : vector<8x128xi32>
      %c2_i32 = arith.constant 2 : i32
      %53 = vector.broadcast %c2_i32 : i32 to vector<8x128xi32>
      %54 = arith.cmpi eq, %48, %53 : vector<8x128xi32>
      %cst_38 = arith.constant 0.000000e+00 : f32
      %55 = vector.broadcast %47 : f32 to vector<8x128xf32>
      %56 = vector.broadcast %cst_38 : f32 to vector<8x128xf32>
      %57 = arith.select %54, %55, %56 : vector<8x128xi1>, vector<8x128xf32>
      %58 = vector.broadcast %42 : f32 to vector<8x128xf32>
      %59 = arith.select %52, %58, %57 : vector<8x128xi1>, vector<8x128xf32>
      %60 = vector.broadcast %37 : f32 to vector<8x128xf32>
      %61 = arith.select %50, %60, %59 : vector<8x128xi1>, vector<8x128xf32>
      %c0_39 = arith.constant 0 : index
      %c0_40 = arith.constant 0 : index
      %62 = vector.load %arg8[%c0_39, %c0_40] : memref<8x128xf32, #tpu.memory_space<vmem>>, vector<8x128xf32>
      tpu.vector_store %arg8[%c0_39, %c0_40], %61 {strides = array<i32>} : memref<8x128xf32, #tpu.memory_space<vmem>>, vector<8x128xf32>,
    } else {
    }
    return
  }
  func.func @transform_0(%arg0: i32, %arg1: i32) -> (i32, i32) {
    %c1_i32 = arith.constant 1 : i32
    %0 = arith.muli %arg0, %c1_i32 : i32
    %1 = arith.addi %0, %arg1 : i32
    %c0_i32 = arith.constant 0 : i32
    %c0_i32_0 = arith.constant 0 : i32
    return %1, %c0_i32 : i32, i32
  }
  func.func @transform_1(%arg0: i32, %arg1: i32) -> (i32, i32) {
    %c1_i32 = arith.constant 1 : i32
    %0 = arith.muli %arg0, %c1_i32 : i32
    %1 = arith.addi %0, %arg1 : i32
    %c0_i32 = arith.constant 0 : i32
    %c0_i32_0 = arith.constant 0 : i32
    return %1, %c0_i32 : i32, i32
  }
  func.func @transform_2(%arg0: i32, %arg1: i32) -> (i32, i32) {
    %c1_i32 = arith.constant 1 : i32
    %0 = arith.muli %arg0, %c1_i32 : i32
    %1 = arith.addi %0, %arg1 : i32
    %c0_i32 = arith.constant 0 : i32
    %c0_i32_0 = arith.constant 0 : i32
    return %1, %c0_i32 : i32, i32
  }
  func.func @transform_3(%arg0: i32, %arg1: i32) -> (i32, i32) {
    %c1_i32 = arith.constant 1 : i32
    %0 = arith.muli %arg0, %c1_i32 : i32
    %1 = arith.addi %0, %arg1 : i32
    %c0_i32 = arith.constant 0 : i32
    %c0_i32_0 = arith.constant 0 : i32
    return %1, %c0_i32 : i32, i32
  }
  func.func @transform_4(%arg0: i32, %arg1: i32) -> (i32, i32) {
    %c1_i32 = arith.constant 1 : i32
    %0 = arith.muli %arg0, %c1_i32 : i32
    %1 = arith.addi %0, %arg1 : i32
    %c0_i32 = arith.constant 0 : i32
    %c0_i32_0 = arith.constant 0 : i32
    return %1, %c0_i32 : i32, i32
  }
  func.func @transform_5(%arg0: i32, %arg1: i32) -> (i32, i32) {
    %c1_i32 = arith.constant 1 : i32
    %0 = arith.muli %arg0, %c1_i32 : i32
    %1 = arith.addi %0, %arg1 : i32
    %c0_i32 = arith.constant 0 : i32
    %c0_i32_0 = arith.constant 0 : i32
    return %1, %c0_i32 : i32, i32
  }
  func.func @transform_6(%arg0: i32, %arg1: i32) -> (i32, i32) {
    %c0_i32 = arith.constant 0 : i32
    %c0_i32_0 = arith.constant 0 : i32
    return %arg0, %c0_i32 : i32, i32
  }
}

</mosaic_0001>

<bundles_post_ra>
// kernel: _generator_loss.1
= control target key start
LH: loop header
LB: loop body
LE: loop exit
PB: predicated region body
PF: predicated region fallthrough
CT: control target
= control target key end

     0   :  { %s686_s21 = smov 0   ;;  %s688_s22 = smov 0   ;;  %s743_s0 = inlined_call_operand.vmem [shape: f32[16,128], index: 0, kind: input, shape index: {}]   ;;  %s744_s1 = inlined_call_operand.vmem [shape: f32[16,128], index: 1, kind: input, shape index: {}]   ;;  %s745_s2 = inlined_call_operand.vmem [shape: f32[16,128], index: 2, kind: input, shape index: {}]   ;;  %s746_s3 = inlined_call_operand.vmem [shape: f32[16,128], index: 3, kind: input, shape index: {}]   ;;  %s747_s4 = inlined_call_operand.vmem [shape: f32[16,128], index: 4, kind: input, shape index: {}]   ;;  %s748_s5 = inlined_call_operand.vmem [shape: f32[16,128], index: 5, kind: input, shape index: {}]   ;;  %s749_s6 = inlined_call_operand.vmem [shape: f32[16,128], index: 6, kind: output, shape index: {}]  }
   0x1   :  { %s690_s23 = smov 0  }
   0x2 LB: > { %s28_s24 = sadd.s32 1, %s645_s22  ;;  %p587_p0 = scmp.ge.s32.totalorder %s649_s23, 1  ;;  %s649_s23 = sphi %s690_s23, %s16_s23   ;;  %s645_s22 = sphi %s688_s22, %s751_s22   ;;  %s641_s21 = sphi %s686_s21, %s750_s21  }
   0x3   : > { %p30_p1 = scmp.ge.s32.totalorder %s28_s24, 2  ;;  %p292_p2 = scmp.lt.s32.totalorder %s649_s23, 3 }
   0x5   : > { %s753_s24 = smov (%p30_p1, %s28_s24), 0  ;;  %p293_p3 = pnand %p587_p0, %p292_p2 }
   0x6   : > { %p347_p4 = scmp.lt.s32.totalorder (!%p293_p3), %s641_s21, 1 }
   0x7   : > { %296 = sbr.rel (%p293_p3) target bundleno = 233 (0xe9), region = 44 }
   0xc   : > { %s755_s21 = smov (!%p347_p4, %s641_s21), 1  ;;  %v450_v33 = vlaneseq }
   0xd   : > { %s704_s25 = sshll.u32 %s755_s21, 3 }
   0xe   : > { %s374_s28 = scalar_lea.vmem %s747_s4, %s704_s25  ;;  %s380_s7 = scalar_lea.vmem %s748_s5, %s704_s25  ;;  %v451_v34 = vand.u32 127, %v450_v33 }
   0xf   : > { %v409_v0 = vld [vmem:[%s374_s28] sm:$0xff]  ;;  %s350_s10 = scalar_lea.vmem %s743_s0, %s704_s25  ;;  %s356_s13 = scalar_lea.vmem %s744_s1, %s704_s25 }
  0x10   : > { %v410_v1 = vld [vmem:[%s380_s7] sm:$0xff]  ;;  %s362_s16 = scalar_lea.vmem %s745_s2, %s704_s25  ;;  %s368_s19 = scalar_lea.vmem %s746_s3, %s704_s25  ;;  %vm454_vm0 = vcmp.eq.s32.totalorder %v451_v34, 2  ;;  %vm453_vm1 = vcmp.eq.s32.totalorder %v451_v34, 1  ;;  %vm452_vm2 = vcmp.eq.s32.totalorder %v451_v34, 0 }
  0x11   : > { %v411_v2 = vsub.f32 %v409_v0, %v410_v1  ;;  %v393_v3 = vld [vmem:[%s350_s10] sm:$0xff]  ;;  %s385_s29 = scalar_lea.vmem %s749_s6, %s704_s25 }
  0x12   : > { %v394_v4 = vld [vmem:[%s356_s13] sm:$0xff] }
  0x13   : > { %v395_v5 = vsub.f32 %v393_v3, %v394_v4  ;;  %v401_v6 = vld [vmem:[%s362_s16] sm:$0xff]  ;;  %v413_v8 = vmul.f32 %v411_v2, %v411_v2 }
  0x14   : > { %v402_v7 = vld [vmem:[%s368_s19] sm:$0xff] }
  0x15   : > { %v403_v9 = vsub.f32 %v401_v6, %v402_v7  ;;  %v396_v10 = vmul.f32 %v395_v5, %v395_v5  ;;  %441 = vadd.xlane.f32.xlu1 %v413_v8 }
  0x17   : > { %421 = vadd.xlane.f32.xlu0 %v396_v10  ;;  %v405_v11 = vmul.f32 %v403_v9, %v403_v9 }
  0x1b   : > { %431 = vadd.xlane.f32.xlu0 %v405_v11 }
  0x9e   : > { %v442_v12 = vpop.xlane.xlu1 %441 }
  0x9f   : > { %v443_v13 = vrot.slane %v442_v12, 4 }
  0xa0   : > { %v422_v14 = vpop.xlane.xlu0 %421 }
  0xa1   : > { %v423_v15 = vrot.slane %v422_v14, 4  ;;  %v444_v16 = vadd.f32 %v443_v13, %v442_v12 }
  0xa3   : > { %v424_v17 = vadd.f32 %v423_v15, %v422_v14  ;;  %v445_v18 = vrot.slane %v444_v16, 2 }
  0xa4   : > { %v432_v19 = vpop.xlane.xlu0 %431 }
  0xa5   : > { %v425_v20 = vrot.slane %v424_v17, 2  ;;  %v433_v21 = vrot.slane %v432_v19, 4  ;;  %v446_v24 = vadd.f32 %v445_v18, %v444_v16 }
  0xa7   : > { %v434_v22 = vadd.f32 %v433_v21, %v432_v19  ;;  %v426_v23 = vadd.f32 %v425_v20, %v424_v17  ;;  %v447_v29 = vrot.slane %v446_v24, 1 }
  0xa9   : > { %v435_v25 = vrot.slane %v434_v22, 2  ;;  %v427_v26 = vrot.slane %v426_v23, 1  ;;  %v448_v32 = vadd.f32 %v447_v29, %v446_v24 }
  0xab   : > { %v436_v27 = vadd.f32 %v435_v25, %v434_v22  ;;  %v428_v28 = vadd.f32 %v427_v26, %v426_v23 }
  0xad   : > { %597 = vpush %v428_v28  ;;  %v437_v30 = vrot.slane %v436_v27, 1 }
  0xaf   : > { %v438_v31 = vadd.f32 %v437_v30, %v436_v27 }
  0xb1   : > { %599 = vpush %v438_v31 }
  0xb2   : > { %601 = vpush %v448_v32 }
  0xde   : > { %s598_s20 = spop %597 }
  0xdf   : > { %v459_v38 = vstv %s598_s20 }
  0xe2   : > { %s600_s21 = spop %599 }
  0xe3   : > { %v457_v35 = vstv %s600_s21  ;;  %s602_s26 = spop %601 }
  0xe4   : > { %v455_v36 = vstv %s602_s26 }
  0xe5   : > { %v456_v37 = vsel %vm454_vm0, %v455_v36, 0.0 }
  0xe6   : > { %v458_v39 = vsel %vm453_vm1, %v457_v35, %v456_v37 }
  0xe7   : > { %v460_v40 = vsel %vm452_vm2, %v459_v38, %v458_v39 }
  0xe8   : > { %461 = vst [vmem:[%s385_s29] sm:$0xff] %v460_v40 }
  0xe9 PF: > { %s16_s23 = sadd.s32 1, %s649_s23   ;;  %s750_s21 = smov %s645_s22 }
  0xea   : > { %p13_p5 = scmp.ge.s32.totalorder %s16_s23, 4   ;;  %s751_s22 = smov %s753_s24 }
  0xec   :  { %15 = sbr.rel (!%p13_p5) target bundleno = 2 (0x2), region = 97 }

</bundles_post_ra>
